<compile_context>
chip_gen: v6e
topology: v6e:2x2x1
jax: 0.10.0
libtpu: 0.0.40
codegen_flags: <defaults>
</compile_context>

<pallas_src>
import functools

import jax
import jax.numpy as jnp
from jax.experimental import pallas as pl
from jax.experimental.pallas import tpu as pltpu


# -------------------------------------------------------------------------
# Pallas kernel
# -------------------------------------------------------------------------
def _focal_loss_kernel(x_ref, tgt_ref, psum_ref, *, gamma, batch_size, has_tail):
    i = pl.program_id(0)

    x = x_ref[...].astype(jnp.float32)          # [TB, C]; cast on-tile (hidden under DMA)
    tgt = tgt_ref[...]                          # [TB, 1] int32
    tb, c = x.shape

    # per-sample cross-entropy (reduction='none', weight=None)
    col = jax.lax.broadcasted_iota(jnp.int32, (tb, c), 1)
    mx = jnp.max(x, axis=1, keepdims=True)                                   # [TB,1]
    lse = jnp.log(jnp.sum(jnp.exp(x - mx), axis=1, keepdims=True)) + mx      # [TB,1]
    # compare + select + XLU sum (cheaper than one-hot astype + multiply)
    tgt_logit = jnp.sum(jnp.where(col == tgt, x, 0.0), axis=1, keepdims=True)
    ce = lse - tgt_logit                                                     # [TB,1]

    # Lane-dense relayout of the per-row stage: a [TB,1] column uses 1/128 lanes
    # per vreg; when TB % 128 == 0 one relayout makes exp/pow/mask/sum dense.
    if tb % 128 == 0:
        ce = ce.reshape(tb // 128, 128)
        local_row = (jax.lax.broadcasted_iota(jnp.int32, ce.shape, 0) * 128
                     + jax.lax.broadcasted_iota(jnp.int32, ce.shape, 1))
    else:
        local_row = jax.lax.broadcasted_iota(jnp.int32, ce.shape, 0)

    # focal modulation: (1 - exp(-ce))**gamma * ce
    p = jnp.exp(-ce)
    q = 1.0 - p
    g = float(gamma)
    if g == int(g):
        # exponentiation by squaring with plain multiplies (robust for q ~ -eps,
        # matches PyTorch's exact (1-p)**int_gamma behaviour)
        w = jnp.ones_like(q)
        n, base = int(g), q
        while n > 0:
            if n & 1:
                w = w * base
            n >>= 1
            if n:
                base = base * base
    else:
        # clamp: q can round slightly negative and pow -> exp(g*log(q)) -> NaN
        w = jnp.maximum(q, 0.0) ** jnp.float32(g)
    per_sample = w * ce

    def _write(vals):
        s = jnp.sum(jnp.sum(vals, axis=1, keepdims=True), axis=0, keepdims=True)
        psum_ref[...] = s.reshape(1, 1, 1)

    if not has_tail:
        # B % TB == 0: no masking anywhere (static).
        _write(per_sample)
    else:
        last = pl.num_programs(0) - 1

        @pl.when(i < last)
        def _full_tile():
            _write(per_sample)

        @pl.when(i == last)
        def _partial_tile():
            # true select: padded rows may hold inf/NaN garbage; a multiply-mask
            # would propagate NaN into the sum.
            valid = (i * tb + local_row) < batch_size
            _write(jnp.where(valid, per_sample, 0.0))


# -------------------------------------------------------------------------
# Wrapper helpers
# -------------------------------------------------------------------------
def _device_vmem_bytes():
    """Physical VMEM per TensorCore (128 MiB v5e/v6e, 64 MiB v7x); safe fallback."""
    try:
        cap = getattr(pltpu.get_tpu_info(), "vmem_capacity_bytes", None)
        if cap:
            return int(cap)
    except Exception:
        pass
    return 64 * 1024 * 1024   # conservative: v7x per-TC VMEM


def _sublane_align(itemsize):
    # packed sublane count: 8 for f32/i32, 16 for bf16/f16, 32 for int8/fp8
    return max(8, 32 // max(1, itemsize))


def _pick_block_rows(batch, num_classes, itemsize, per_buffer_bytes):
    """Size the logits tile by bytes, not a row cap (mem-bound streaming kernel)."""
    row_bytes = max(1, num_classes * itemsize)
    rows = per_buffer_bytes // row_bytes
    if rows >= batch:
        return batch                         # single full-extent block
    if rows >= 128:
        return (rows // 128) * 128           # multiple of 128 => lane-dense per-row stage
    align = _sublane_align(itemsize)
    return max(align, (rows // align) * align)


def focal_loss_tpu(inputs, target, epoch=None, split=None, *,
                   gamma=2, weight=None, block_rows=None):
    """FocalLoss.forward. `epoch` / `split` are accepted (and ignored) for parity."""
    # TODO(synk): per-class `weight` for F.cross_entropy not implemented (module default is None).
    assert weight is None
    assert gamma >= 0
    del epoch, split

    B, C = inputs.shape
    tgt = target.astype(jnp.int32).reshape(B, 1)
    itemsize = jnp.dtype(inputs.dtype).itemsize

    # Generation-aware VMEM budget; only the logits tile is a large stream
    # (double-buffered by the BlockSpec pipeline), targets are B*4 bytes.
    vmem_limit = int(_device_vmem_bytes() * 3 // 4)       # headroom for compiler scratch
    per_buffer = min(12 * 1024 * 1024, vmem_limit // 4)   # x2 for double buffering

    align = _sublane_align(itemsize)
    if block_rows is not None:
        tb = int(block_rows)
        assert tb == B or (tb % align == 0 and tb <= B), (
            f"block_rows={tb} must equal B={B} or be a multiple of {align} and <= B")
    else:
        tb = _pick_block_rows(B, C, itemsize, per_buffer)

    num_tiles = pl.cdiv(B, tb)
    has_tail = (B % tb) != 0

    kernel = functools.partial(
        _focal_loss_kernel, gamma=gamma, batch_size=B, has_tail=has_tail)

    partials = pl.pallas_call(
        kernel,
        out_shape=jax.ShapeDtypeStruct((num_tiles, 1, 1), jnp.float32),
        grid_spec=pltpu.PrefetchScalarGridSpec(
            num_scalar_prefetch=0,
            grid=(num_tiles,),
            in_specs=[
                pl.BlockSpec((tb, C), lambda i: (i, 0)),   # logits tile (native dtype)
                pl.BlockSpec((tb, 1), lambda i: (i, 0)),   # targets tile
            ],
            # each step writes its own partial sum => grid axis is truly parallel
            # (megacore on v7x); final sum/B happens in the wrapper.
            out_specs=pl.BlockSpec((1, 1, 1), lambda i: (i, 0, 0)),
        ),
        compiler_params=pltpu.CompilerParams(
            dimension_semantics=("parallel",),
            vmem_limit_bytes=vmem_limit),
        cost_estimate=pl.CostEstimate(
            flops=10 * B * C,
            transcendentals=B * (C + 2),
            bytes_accessed=B * C * itemsize + B * 4 + num_tiles * 4),
    )(inputs, tgt)

    return jnp.sum(partials) / jnp.float32(B)


# -------------------------------------------------------------------------
# Pure-JAX reference (for a silent sanity check)
# -------------------------------------------------------------------------
def focal_loss_ref(inputs, target, gamma=2):
    x = inputs.astype(jnp.float32)
    logp = jax.nn.log_softmax(x, axis=1)
    ce = -jnp.take_along_axis(logp, target.astype(jnp.int32)[:, None], axis=1)[:, 0]
    p = jnp.exp(-ce)
    return jnp.mean((1.0 - p) ** gamma * ce)


if __name__ == "__main__":
    key = jax.random.PRNGKey(0)
    epoch = {"epoch": 5}

    # 1) small single-block case (logits [B, C], targets [B])
    B, C = 8, 16
    split = {"split": "train", "num_classes": C}
    k1, k2 = jax.random.split(key)
    inputs = jax.random.normal(k1, (B, C), dtype=jnp.float32)
    target = jax.random.randint(k2, (B,), 0, C, dtype=jnp.int32)
    loss = focal_loss_tpu(inputs, target, epoch, split)
    jax.block_until_ready(loss)
    ref = focal_loss_ref(inputs, target)
    assert jnp.allclose(loss, ref, rtol=1e-4, atol=1e-5), (loss, ref)

    # 2) bf16 input, multi-block grid with a partial (masked) last tile
    #    (column-vector per-row path, sublane-16 alignment)
    B2, C2 = 40, 16
    k3, k4 = jax.random.split(k1)
    inputs2 = jax.random.normal(k3, (B2, C2), dtype=jnp.bfloat16)
    target2 = jax.random.randint(k4, (B2,), 0, C2, dtype=jnp.int32)
    loss2 = focal_loss_tpu(inputs2, target2, epoch, split, block_rows=16)
    jax.block_until_ready(loss2)
    ref2 = focal_loss_ref(inputs2, target2)
    assert jnp.allclose(loss2, ref2, rtol=1e-3, atol=1e-4), (loss2, ref2)

    # 3) f32, 128-row tiles => lane-dense per-row stage + masked tail
    B3, C3 = 300, 40
    k5, k6 = jax.random.split(k2)
    inputs3 = jax.random.normal(k5, (B3, C3), dtype=jnp.float32)
    target3 = jax.random.randint(k6, (B3,), 0, C3, dtype=jnp.int32)
    loss3 = focal_loss_tpu(inputs3, target3, epoch, split, block_rows=128)
    jax.block_until_ready(loss3)
    ref3 = focal_loss_ref(inputs3, target3)
    assert jnp.allclose(loss3, ref3, rtol=1e-4, atol=1e-5), (loss3, ref3)

    print("KERNEL_OK")
</pallas_src>

<mosaic_0001>
module attributes {stable_mosaic.version = 11 : i64} {
  func.func @_focal_loss_kernel(%arg0: i32, %arg1: memref<8x16xf32, #tpu.memory_space<vmem>>, %arg2: memref<8x1xi32, #tpu.memory_space<vmem>>, %arg3: memref<1x1x1xf32, #tpu.memory_space<vmem>>) attributes {dimension_semantics = [#tpu.dimension_semantics<parallel>], iteration_bounds = array<i64: 1>, scalar_prefetch = 0 : i64, scratch_operands = 0 : i64, tpu.core_type = #tpu.core_type<tc>, window_params = [{transform_indices = @transform_0, window_bounds = array<i64: 8, 16>}, {transform_indices = @transform_1, window_bounds = array<i64: 8, 1>}, {transform_indices = @transform_2, window_bounds = array<i64: 1, 1, 1>}]} {
    %c0 = arith.constant 0 : index
    %c0_0 = arith.constant 0 : index
    %0 = vector.load %arg1[%c0, %c0_0] : memref<8x16xf32, #tpu.memory_space<vmem>>, vector<8x16xf32>
    %c0_1 = arith.constant 0 : index
    %c0_2 = arith.constant 0 : index
    %1 = vector.load %arg2[%c0_1, %c0_2] : memref<8x1xi32, #tpu.memory_space<vmem>>, vector<8x1xi32>
    %2 = tpu.iota {dimensions = array<i32: 1>} : vector<8x16xi32>
    %cst = arith.constant dense<0xFF800000> : vector<8xf32>
    %3 = vector.multi_reduction <maximumf>, %0, %cst [1] : vector<8x16xf32> to vector<8xf32>
    %4 = vector.shape_cast %3 : vector<8xf32> to vector<8x1xf32>
    %5 = vector.broadcast %4 : vector<8x1xf32> to vector<8x16xf32>
    %6 = arith.subf %0, %5 : vector<8x16xf32>
    %7 = math.exp %6 : vector<8x16xf32>
    %cst_3 = arith.constant dense<0.000000e+00> : vector<8xf32>
    %8 = vector.multi_reduction <add>, %7, %cst_3 [1] : vector<8x16xf32> to vector<8xf32>
    %9 = vector.shape_cast %8 : vector<8xf32> to vector<8x1xf32>
    %10 = math.log %9 : vector<8x1xf32>
    %11 = arith.addf %10, %4 : vector<8x1xf32>
    %12 = vector.broadcast %1 : vector<8x1xi32> to vector<8x16xi32>
    %13 = arith.cmpi eq, %2, %12 : vector<8x16xi32>
    %cst_4 = arith.constant 0.000000e+00 : f32
    %14 = vector.broadcast %cst_4 : f32 to vector<8x16xf32>
    %15 = arith.select %13, %0, %14 : vector<8x16xi1>, vector<8x16xf32>
    %cst_5 = arith.constant dense<0.000000e+00> : vector<8xf32>
    %16 = vector.multi_reduction <add>, %15, %cst_5 [1] : vector<8x16xf32> to vector<8xf32>
    %17 = vector.shape_cast %16 : vector<8xf32> to vector<8x1xf32>
    %18 = arith.subf %11, %17 : vector<8x1xf32>
    %cst_6 = arith.constant 0.000000e+00 : f32
    %19 = vector.broadcast %cst_6 : f32 to vector<8x1xf32>
    %20 = arith.subf %19, %18 : vector<8x1xf32>
    %21 = math.exp %20 : vector<8x1xf32>
    %cst_7 = arith.constant 1.000000e+00 : f32
    %22 = vector.broadcast %cst_7 : f32 to vector<8x1xf32>
    %23 = arith.subf %22, %21 : vector<8x1xf32>
    %cst_8 = arith.constant 1.000000e+00 : f32
    %24 = vector.broadcast %cst_8 : f32 to vector<8x1xf32>
    %25 = arith.mulf %23, %23 : vector<8x1xf32>
    %26 = arith.mulf %24, %25 : vector<8x1xf32>
    %27 = arith.mulf %26, %18 : vector<8x1xf32>
    %cst_9 = arith.constant dense<0.000000e+00> : vector<8xf32>
    %28 = vector.multi_reduction <add>, %27, %cst_9 [1] : vector<8x1xf32> to vector<8xf32>
    %29 = vector.shape_cast %28 : vector<8xf32> to vector<8x1xf32>
    %cst_10 = arith.constant dense<0.000000e+00> : vector<1xf32>
    %30 = vector.multi_reduction <add>, %29, %cst_10 [0] : vector<8x1xf32> to vector<1xf32>
    %31 = vector.shape_cast %30 : vector<1xf32> to vector<1x1xf32>
    %32 = vector.shape_cast %31 : vector<1x1xf32> to vector<1x1x1xf32>
    %c0_11 = arith.constant 0 : index
    %c0_12 = arith.constant 0 : index
    %c0_13 = arith.constant 0 : index
    %33 = vector.load %arg3[%c0_11, %c0_12, %c0_13] : memref<1x1x1xf32, #tpu.memory_space<vmem>>, vector<1x1x1xf32>
    tpu.vector_store %arg3[%c0_11, %c0_12, %c0_13], %32 {strides = array<i32>} : memref<1x1x1xf32, #tpu.memory_space<vmem>>, vector<1x1x1xf32>,
    return
  }
  func.func @transform_0(%arg0: i32) -> (i32, i32) {
    %c0_i32 = arith.constant 0 : i32
    %c0_i32_0 = arith.constant 0 : i32
    return %arg0, %c0_i32 : i32, i32
  }
  func.func @transform_1(%arg0: i32) -> (i32, i32) {
    %c0_i32 = arith.constant 0 : i32
    %c0_i32_0 = arith.constant 0 : i32
    return %arg0, %c0_i32 : i32, i32
  }
  func.func @transform_2(%arg0: i32) -> (i32, i32, i32) {
    %c0_i32 = arith.constant 0 : i32
    %c0_i32_0 = arith.constant 0 : i32
    %c0_i32_1 = arith.constant 0 : i32
    return %arg0, %c0_i32, %c0_i32_0 : i32, i32, i32
  }
}

</mosaic_0001>

<bundles_post_ra>
// kernel: tpu_custom_call.1
= control target key start
LH: loop header
LB: loop body
LE: loop exit
PB: predicated region body
PF: predicated region fallthrough
CT: control target
= control target key end

     0   :  { %vm16_vm0 = vcmask 130048   ;;  %s127_s0 = inlined_call_operand.vmem [shape: f32[8,16], index: 0, kind: input, shape index: {}]   ;;  %s128_s1 = inlined_call_operand.vmem [shape: s32[8,1], index: 1, kind: input, shape index: {}]   ;;  %s129_s2 = inlined_call_operand.hbm [shape: f32[1,1,1], index: 2, kind: output, shape index: {}]  }
   0x1   :  { %v12_v0 = vld [vmem:[%s127_s0] sm:$0xff] }
   0x2   :  { %7 = vsyncpa [#allocation3], 0  ;;  %v17_v1 = vsel %vm16_vm0, %v12_v0, -inf  ;;  %v98_v2 = vmov 0   ;;  %v13_v3 = vld [vmem:[%s128_s1] sm:$0xff]  ;;  %v14_v7 = vlaneseq  ;;  %s99_s0 = smov [#allocation2]  }
   0x3   :  { %69 = vset.pattern.permute.xlu0 %v98_v2  ;;  %s59_s1 = sshll.u32 %s99_s0, 4  ;;  %vm51_vm2 = vcmask 0   ;;  %s60_s1 = int_to_ptr.vmem [resolvable:$true] %s59_s1 }
   0x4   :  { %18 = vmax.xlane.f32.xlu0 %v17_v1  ;;  %v15_v8 = vand.u32 127, %v14_v7  ;;  %s76_s13 = scalar_lea.vmem %s60_s1, 16  ;;  %s80_s14 = scalar_lea.vmem %s60_s1, 32 }
   0x5   :  { %p77_p0 = scmp.ne.s32.totalorder %s60_s1, %s76_s13  ;;  %p81_p1 = scmp.lt.s32.totalorder %s60_s1, %s60_s1 }
   0x6   :  { %p82_p2 = scmp.lt.s32.totalorder %s80_s14, %s76_s13 }
   0x8   :  { %p83_p3 = por %p82_p2, %p81_p1 }
   0xa   :  { %p84_p4 = pnand %p83_p3, %p77_p0 }
  0x1a   :  { %30 = vperm.xlu0 %69, %v13_v3  }
  0x8d   :  { %v19_v4 = vpop.xlane.xlu0 %18 }
  0x8e   :  { %v20_v5 = vsub.f32 %v12_v0, %v19_v4 }
  0x90   :  { %v21_v6 = vmul.f32 1.442695, %v20_v5 }
  0x92   :  { %70 = vpow2.f32 %v21_v6 }
  0x95   :  { %v31_v9 = vpop.permute.xlu0 %30 }
  0x96   :  { %vm32_vm1 = vcmp.eq.s32.totalorder %v15_v8, %v31_v9 }
  0x97   :  { %v33_v11 = vsel %vm32_vm1, %v12_v0, 0.0 }
  0x98   :  { %v34_v13 = vsel %vm16_vm0, %v33_v11, 0.0 }
  0x9f   :  { %v71_v10 = vpop.eup %70 }
  0xa0   :  { %v23_v12 = vsel %vm16_vm0, %v71_v10, 0.0 }
  0xa1   :  { %24 = vadd.xlane.f32.xlu1 %v23_v12 }
  0xa5   :  { %35 = vadd.xlane.f32.xlu1 %v34_v13 }
 0x12a   :  { %v25_v14 = vpop.xlane.xlu1 %24 }
 0x12b   :  { %72 = vlog2.f32 %v25_v14 }
 0x12e   :  { %v36_v17 = vpop.xlane.xlu1 %35 }
 0x138   :  { %v73_v15 = vpop.eup %72 }
 0x139   :  { %v27_v16 = vmul.f32 0.6931472, %v73_v15 }
 0x13b   :  { %v28_v18 = vadd.f32 %v27_v16, %v19_v4 }
 0x13d   :  { %v37_v19 = vsub.f32 %v28_v18, %v36_v17 }
 0x13f   :  { %v38_v20 = vsub.f32 0.0, %v37_v19 }
 0x141   :  { %v39_v21 = vmul.f32 1.442695, %v38_v20 }
 0x143   :  { %74 = vpow2.f32 %v39_v21 }
 0x150   :  { %v75_v22 = vpop.eup %74 }
 0x151   :  { %v41_v23 = vsub.f32 1.0, %v75_v22 }
 0x153   :  { %v42_v24 = vmul.f32 %v41_v23, %v41_v23 }
 0x155   :  { %v43_v25 = vmul.f32 %v42_v24, %v37_v19 }
 0x157   :  { %v45_v26 = vrot.slane %v43_v25, 4 }
 0x159   :  { %v46_v27 = vadd.f32 %v45_v26, %v43_v25 }
 0x15b   :  { %v47_v28 = vrot.slane %v46_v27, 2 }
 0x15d   :  { %v48_v29 = vadd.f32 %v47_v28, %v46_v27 }
 0x15f   :  { %v49_v30 = vrot.slane %v48_v29, 1 }
 0x161   :  { %v50_v31 = vadd.f32 %v49_v30, %v48_v29 }
 0x163   :  { %52 = vst.msk [vmem:[#allocation2] sm:$0x1] %vm51_vm2, %v50_v31 }
 0x164   :  { %87 = shalt.err (!%p84_p4)
}
 0x165   :  { %62 = dma.vmem_to_hbm [thread:$0]  %s60_s1, 16, %s129_s2, [#allocation3]  }
 0x166   :  { %96 = dma.done.wait [#allocation3], 16  }
 0x167   :  { %97 = vsyncadd [#allocation3], 4294967280 }
 0x168   :  { %66 = vsyncpa [#allocation3], 1 }

</bundles_post_ra>
